<compile_context>
chip_gen: v5e
topology: v5e:2x2
jax: 0.10.0
libtpu: 0.0.40
codegen_flags: <defaults>
</compile_context>

<pallas_src>
import jax
import jax.numpy as jnp
from jax import lax
from jax.experimental import pallas as pl
from jax.experimental.pallas import tpu as pltpu

NUM_TEMPS = 800              # j = 0..799 ; t_j = 1.0 - 0.00125 * j  (matches torch loop)
TEMP_STEP = 0.00125
TOL = 0.01
TARGET_VAL = 0.2666666667
NEW_BIN_LOWERS = (0.8, 0.86666666666, 0.93333333333)
CONF_SCALE = (1.0 / 15.0) / TARGET_VAL   # fold the /TARGET_VAL divide into one constant

COARSE_STRIDE = 8
NUM_COARSE = NUM_TEMPS // COARSE_STRIDE  # 100 coarse candidates: j = 0, 8, ..., 792
NUM_FINE = COARSE_STRIDE                 # 8-wide refine window


def logit_compression_kernel(x_ref, w_ref, b_ref, out_ref):
    # --- stand-in backbone: linear classifier (single MXU matmul, bf16 in / f32 acc) ---
    logits = jnp.dot(x_ref[...], w_ref[...],
                     preferred_element_type=jnp.float32) + b_ref[...]      # (B, C) f32

    lmax = jnp.max(logits, axis=1, keepdims=True)                          # (B, 1)
    diffs = logits - lmax                                                  # (B, C), <= 0

    # ---- coarse pass: candidates j = 0, 8, ..., 792 lane-dense on the last axis ----
    k_iota = lax.broadcasted_iota(jnp.int32, (1, 1, NUM_COARSE), 2).astype(jnp.float32)
    j_coarse = k_iota * float(COARSE_STRIDE)                               # (1,1,NC)
    inv_t_coarse = 1.0 / (1.0 - TEMP_STEP * j_coarse)                      # (1,1,NC)
    e_coarse = jnp.exp(diffs[:, :, None] * inv_t_coarse)                   # (B, C, NC)
    s_coarse = jnp.sum(e_coarse, axis=1)                                   # (B, NC)

    # Temperature-1 confidence is column 0 of the coarse pass (inv_t[0] == 1.0 exactly):
    # conf = max softmax(logits) = exp(0) / sum_c exp(diffs_c) = 1 / s_coarse[:, 0].
    s1 = s_coarse[:, 0:1]                                                  # (B, 1)
    conf = 1.0 / s1                                                        # (B, 1)

    # --- ECE-style binning: bin_boundaries = linspace(0, 1, 4) ---
    one_third = jnp.float32(1.0 / 3.0)
    two_third = jnp.float32(2.0 / 3.0)
    bidx = (conf >= one_third).astype(jnp.int32) + (conf >= two_third).astype(jnp.int32)
    min_val = jnp.where(bidx == 0, NEW_BIN_LOWERS[0],
               jnp.where(bidx == 1, NEW_BIN_LOWERS[1], NEW_BIN_LOWERS[2]))
    bin_lower = jnp.where(bidx == 0, jnp.float32(0.0),
                 jnp.where(bidx == 1, one_third, two_third))
    new_conf = min_val + CONF_SCALE * (conf - bin_lower)                   # (B, 1)

    # Hoisted thresholds: conf >= thr  <=>  s <= 1/thr ;  conf <= up  <=>  s >= 1/up.
    thr = new_conf - TOL                                                   # > 0 in practice
    up = new_conf + TOL
    safe_thr = jnp.where(thr > 0.0, thr, jnp.float32(1.0))
    inv_thr = jnp.where(thr > 0.0, 1.0 / safe_thr, jnp.float32(jnp.inf))   # thr<=0 -> always ok
    inv_up = 1.0 / up                                                      # up >= 0.81 > 0

    # --- coarse bracketing: smallest coarse k with conf(t_{8k}) >= thr ---
    k_lane = lax.broadcasted_iota(jnp.int32, s_coarse.shape, 1).astype(jnp.float32)
    ok_coarse = s_coarse <= inv_thr
    k_star = jnp.min(jnp.where(ok_coarse, k_lane, jnp.float32(NUM_COARSE)),
                     axis=1, keepdims=True)                                # (B, 1) f32

    # --- fine pass over the bracketed window [8k*-7, 8k*] (clamped to [0, 799]) ---
    base = jnp.maximum(k_star * float(COARSE_STRIDE) - float(COARSE_STRIDE - 1), 0.0)
    d_lane = lax.broadcasted_iota(jnp.int32, (diffs.shape[0], NUM_FINE), 1).astype(jnp.float32)
    j_fine = jnp.minimum(base + d_lane, float(NUM_TEMPS - 1))              # (B, NF)
    inv_t_fine = 1.0 / (1.0 - TEMP_STEP * j_fine)                          # (B, NF), exact
    e_fine = jnp.exp(diffs[:, :, None] * inv_t_fine[:, None, :])           # (B, C, NF)
    s_fine = jnp.sum(e_fine, axis=1)                                       # (B, NF)

    # First j in the window with |conf - new_conf| <= TOL == first j with both
    # s <= 1/thr and s >= 1/up (monotone s); no post-search re-evaluation needed.
    ok_fine = (s_fine <= inv_thr) & (s_fine >= inv_up)
    d_star = jnp.min(jnp.where(ok_fine, d_lane, jnp.float32(NUM_FINE)),
                     axis=1, keepdims=True)                                # (B, 1)
    found = d_star < float(NUM_FINE)
    j_sel = jnp.minimum(base + d_star, float(NUM_TEMPS - 1))               # (B, 1)

    t_sel = jnp.where(found, 1.0 - TEMP_STEP * j_sel, jnp.float32(1.0))    # (B, 1)
    out_ref[...] = logits * (1.0 / t_sel)    # fallback (t=1) keeps the original logits


def logit_compression(x_nchw, w, b):
    """x_nchw: (B, Cin, H, W); w: (F, C); b: (1, C).  Returns squeezed (B, C) logits."""
    B = x_nchw.shape[0]
    feat = w.shape[0]
    C = w.shape[1]
    x_flat = x_nchw.reshape(B, feat)

    cost = pl.CostEstimate(
        flops=2 * B * feat * C,
        transcendentals=B * C * (NUM_COARSE + NUM_FINE),
        bytes_accessed=2 * (B * feat + feat * C) + 4 * (C + B * C),
    )
    out = pl.pallas_call(
        logit_compression_kernel,
        out_shape=jax.ShapeDtypeStruct((B, C), jnp.float32),
        in_specs=[pl.BlockSpec(memory_space=pltpu.MemorySpace.VMEM)] * 3,
        out_specs=pl.BlockSpec(memory_space=pltpu.MemorySpace.VMEM),
        cost_estimate=cost,
    )(x_flat.astype(jnp.bfloat16), w.astype(jnp.bfloat16), b.astype(jnp.float32))
    return jnp.squeeze(out)   # matches torch `.squeeze()` (no-op for B>1, C>1)


if __name__ == "__main__":
    key = jax.random.PRNGKey(0)
    kx, kw, kb = jax.random.split(key, 3)

    B, Cin, H, W_sp = 2, 4, 16, 16
    num_classes = 16
    feat = Cin * H * W_sp

    # deterministic example input (NCHW, like PyTorch)
    x = jax.random.normal(kx, (B, Cin, H, W_sp), dtype=jnp.float32)

    # deterministic synthetic "model" parameters (stand-in linear classifier)
    w = jax.random.normal(kw, (feat, num_classes), dtype=jnp.float32) * (1.0 / jnp.sqrt(feat))
    b = jax.random.normal(kb, (1, num_classes), dtype=jnp.float32) * 0.01
    # self.temperature = 1.2 exists in the torch module but is unused in forward.

    out = logit_compression(x, w, b)
    jax.block_until_ready(out)
    assert out.shape == (B, num_classes)
    print("KERNEL_OK")
</pallas_src>

<mosaic_0001>
module attributes {stable_mosaic.version = 11 : i64} {
  func.func @logit_compression_kernel(%arg0: memref<2x1024xbf16, #tpu.memory_space<vmem>>, %arg1: memref<1024x16xbf16, #tpu.memory_space<vmem>>, %arg2: memref<1x16xf32, #tpu.memory_space<vmem>>, %arg3: memref<2x16xf32, #tpu.memory_space<vmem>>) attributes {dimension_semantics = [], scalar_prefetch = 0 : i64, scratch_operands = 0 : i64, tpu.core_type = #tpu.core_type<tc>} {
    %c0 = arith.constant 0 : index
    %c0_0 = arith.constant 0 : index
    %0 = vector.load %arg0[%c0, %c0_0] : memref<2x1024xbf16, #tpu.memory_space<vmem>>, vector<2x1024xbf16>
    %c0_1 = arith.constant 0 : index
    %c0_2 = arith.constant 0 : index
    %1 = vector.load %arg1[%c0_1, %c0_2] : memref<1024x16xbf16, #tpu.memory_space<vmem>>, vector<1024x16xbf16>
    %cst = arith.constant dense<0.000000e+00> : vector<2x16xf32>
    %2 = tpu.matmul %0, %1, %cst {dimension_numbers = #tpu.dot_dimension_numbers<[1], [0], [0], [1], [0, 0, 1, 1], [], []>} : vector<2x1024xbf16>, vector<1024x16xbf16>, vector<2x16xf32> -> vector<2x16xf32>
    %c0_3 = arith.constant 0 : index
    %c0_4 = arith.constant 0 : index
    %3 = vector.load %arg2[%c0_3, %c0_4] : memref<1x16xf32, #tpu.memory_space<vmem>>, vector<1x16xf32>
    %4 = vector.broadcast %3 : vector<1x16xf32> to vector<2x16xf32>
    %5 = arith.addf %2, %4 : vector<2x16xf32>
    %cst_5 = arith.constant dense<0xFF800000> : vector<2xf32>
    %6 = vector.multi_reduction <maximumf>, %5, %cst_5 [1] : vector<2x16xf32> to vector<2xf32>
    %7 = vector.shape_cast %6 : vector<2xf32> to vector<2x1xf32>
    %8 = vector.broadcast %7 : vector<2x1xf32> to vector<2x16xf32>
    %9 = arith.subf %5, %8 : vector<2x16xf32>
    %10 = tpu.iota {dimensions = array<i32: 2>} : vector<1x1x100xi32>
    %11 = arith.sitofp %10 : vector<1x1x100xi32> to vector<1x1x100xf32>
    %cst_6 = arith.constant 8.000000e+00 : f32
    %12 = vector.broadcast %cst_6 : f32 to vector<1x1x100xf32>
    %13 = arith.mulf %11, %12 : vector<1x1x100xf32>
    %cst_7 = arith.constant 1.250000e-03 : f32
    %14 = vector.broadcast %cst_7 : f32 to vector<1x1x100xf32>
    %15 = arith.mulf %14, %13 : vector<1x1x100xf32>
    %cst_8 = arith.constant 1.000000e+00 : f32
    %16 = vector.broadcast %cst_8 : f32 to vector<1x1x100xf32>
    %17 = arith.subf %16, %15 : vector<1x1x100xf32>
    %cst_9 = arith.constant 1.000000e+00 : f32
    %18 = vector.broadcast %cst_9 : f32 to vector<1x1x100xf32>
    %19 = arith.divf %18, %17 : vector<1x1x100xf32>
    %20 = vector.shape_cast %9 : vector<2x16xf32> to vector<2x16x1xf32>
    %21 = vector.broadcast %20 : vector<2x16x1xf32> to vector<2x16x100xf32>
    %22 = vector.broadcast %19 : vector<1x1x100xf32> to vector<2x16x100xf32>
    %23 = arith.mulf %21, %22 : vector<2x16x100xf32>
    %24 = math.exp %23 : vector<2x16x100xf32>
    %cst_10 = arith.constant dense<0.000000e+00> : vector<2x100xf32>
    %25 = vector.multi_reduction <add>, %24, %cst_10 [1] : vector<2x16x100xf32> to vector<2x100xf32>
    %26 = vector.extract_strided_slice %25 {offsets = [0, 0], sizes = [2, 1], strides = [1, 1]} : vector<2x100xf32> to vector<2x1xf32>
    %cst_11 = arith.constant 1.000000e+00 : f32
    %27 = vector.broadcast %cst_11 : f32 to vector<2x1xf32>
    %28 = arith.divf %27, %26 : vector<2x1xf32>
    %cst_12 = arith.constant 0.333333343 : f32
    %29 = vector.broadcast %cst_12 : f32 to vector<2x1xf32>
    %30 = arith.cmpf oge, %28, %29 : vector<2x1xf32>
    %31 = arith.extui %30 : vector<2x1xi1> to vector<2x1xi32>
    %cst_13 = arith.constant 0.666666686 : f32
    %32 = vector.broadcast %cst_13 : f32 to vector<2x1xf32>
    %33 = arith.cmpf oge, %28, %32 : vector<2x1xf32>
    %34 = arith.extui %33 : vector<2x1xi1> to vector<2x1xi32>
    %35 = arith.addi %31, %34 : vector<2x1xi32>
    %c0_i32 = arith.constant 0 : i32
    %36 = vector.broadcast %c0_i32 : i32 to vector<2x1xi32>
    %37 = arith.cmpi eq, %35, %36 : vector<2x1xi32>
    %c1_i32 = arith.constant 1 : i32
    %38 = vector.broadcast %c1_i32 : i32 to vector<2x1xi32>
    %39 = arith.cmpi eq, %35, %38 : vector<2x1xi32>
    %cst_14 = arith.constant 0.866666674 : f32
    %cst_15 = arith.constant 0.933333337 : f32
    %40 = vector.broadcast %cst_14 : f32 to vector<2x1xf32>
    %41 = vector.broadcast %cst_15 : f32 to vector<2x1xf32>
    %42 = arith.select %39, %40, %41 : vector<2x1xi1>, vector<2x1xf32>
    %cst_16 = arith.constant 8.000000e-01 : f32
    %43 = vector.broadcast %cst_16 : f32 to vector<2x1xf32>
    %44 = arith.select %37, %43, %42 : vector<2x1xi1>, vector<2x1xf32>
    %c0_i32_17 = arith.constant 0 : i32
    %45 = vector.broadcast %c0_i32_17 : i32 to vector<2x1xi32>
    %46 = arith.cmpi eq, %35, %45 : vector<2x1xi32>
    %c1_i32_18 = arith.constant 1 : i32
    %47 = vector.broadcast %c1_i32_18 : i32 to vector<2x1xi32>
    %48 = arith.cmpi eq, %35, %47 : vector<2x1xi32>
    %cst_19 = arith.constant 0.333333343 : f32
    %cst_20 = arith.constant 0.666666686 : f32
    %49 = vector.broadcast %cst_19 : f32 to vector<2x1xf32>
    %50 = vector.broadcast %cst_20 : f32 to vector<2x1xf32>
    %51 = arith.select %48, %49, %50 : vector<2x1xi1>, vector<2x1xf32>
    %cst_21 = arith.constant 0.000000e+00 : f32
    %52 = vector.broadcast %cst_21 : f32 to vector<2x1xf32>
    %53 = arith.select %46, %52, %51 : vector<2x1xi1>, vector<2x1xf32>
    %54 = arith.subf %28, %53 : vector<2x1xf32>
    %cst_22 = arith.constant 2.500000e-01 : f32
    %55 = vector.broadcast %cst_22 : f32 to vector<2x1xf32>
    %56 = arith.mulf %55, %54 : vector<2x1xf32>
    %57 = arith.addf %44, %56 : vector<2x1xf32>
    %cst_23 = arith.constant 0.00999999977 : f32
    %58 = vector.broadcast %cst_23 : f32 to vector<2x1xf32>
    %59 = arith.subf %57, %58 : vector<2x1xf32>
    %cst_24 = arith.constant 0.00999999977 : f32
    %60 = vector.broadcast %cst_24 : f32 to vector<2x1xf32>
    %61 = arith.addf %57, %60 : vector<2x1xf32>
    %cst_25 = arith.constant 0.000000e+00 : f32
    %62 = vector.broadcast %cst_25 : f32 to vector<2x1xf32>
    %63 = arith.cmpf ogt, %59, %62 : vector<2x1xf32>
    %cst_26 = arith.constant 1.000000e+00 : f32
    %64 = vector.broadcast %cst_26 : f32 to vector<2x1xf32>
    %65 = arith.select %63, %59, %64 : vector<2x1xi1>, vector<2x1xf32>
    %cst_27 = arith.constant 0.000000e+00 : f32
    %66 = vector.broadcast %cst_27 : f32 to vector<2x1xf32>
    %67 = arith.cmpf ogt, %59, %66 : vector<2x1xf32>
    %cst_28 = arith.constant 1.000000e+00 : f32
    %68 = vector.broadcast %cst_28 : f32 to vector<2x1xf32>
    %69 = arith.divf %68, %65 : vector<2x1xf32>
    %cst_29 = arith.constant 0x7F800000 : f32
    %70 = vector.broadcast %cst_29 : f32 to vector<2x1xf32>
    %71 = arith.select %67, %69, %70 : vector<2x1xi1>, vector<2x1xf32>
    %cst_30 = arith.constant 1.000000e+00 : f32
    %72 = vector.broadcast %cst_30 : f32 to vector<2x1xf32>
    %73 = arith.divf %72, %61 : vector<2x1xf32>
    %74 = tpu.iota {dimensions = array<i32: 1>} : vector<2x100xi32>
    %75 = arith.sitofp %74 : vector<2x100xi32> to vector<2x100xf32>
    %76 = vector.broadcast %71 : vector<2x1xf32> to vector<2x100xf32>
    %77 = arith.cmpf ole, %25, %76 : vector<2x100xf32>
    %cst_31 = arith.constant 1.000000e+02 : f32
    %78 = vector.broadcast %cst_31 : f32 to vector<2x100xf32>
    %79 = arith.select %77, %75, %78 : vector<2x100xi1>, vector<2x100xf32>
    %cst_32 = arith.constant dense<0x7F800000> : vector<2xf32>
    %80 = vector.multi_reduction <minimumf>, %79, %cst_32 [1] : vector<2x100xf32> to vector<2xf32>
    %81 = vector.shape_cast %80 : vector<2xf32> to vector<2x1xf32>
    %cst_33 = arith.constant 8.000000e+00 : f32
    %82 = vector.broadcast %cst_33 : f32 to vector<2x1xf32>
    %83 = arith.mulf %81, %82 : vector<2x1xf32>
    %cst_34 = arith.constant 7.000000e+00 : f32
    %84 = vector.broadcast %cst_34 : f32 to vector<2x1xf32>
    %85 = arith.subf %83, %84 : vector<2x1xf32>
    %cst_35 = arith.constant 0.000000e+00 : f32
    %86 = vector.broadcast %cst_35 : f32 to vector<2x1xf32>
    %87 = arith.maximumf %85, %86 : vector<2x1xf32>
    %88 = tpu.iota {dimensions = array<i32: 1>} : vector<2x8xi32>
    %89 = arith.sitofp %88 : vector<2x8xi32> to vector<2x8xf32>
    %90 = vector.broadcast %87 : vector<2x1xf32> to vector<2x8xf32>
    %91 = arith.addf %90, %89 : vector<2x8xf32>
    %cst_36 = arith.constant 7.990000e+02 : f32
    %92 = vector.broadcast %cst_36 : f32 to vector<2x8xf32>
    %93 = arith.minimumf %91, %92 : vector<2x8xf32>
    %cst_37 = arith.constant 1.250000e-03 : f32
    %94 = vector.broadcast %cst_37 : f32 to vector<2x8xf32>
    %95 = arith.mulf %94, %93 : vector<2x8xf32>
    %cst_38 = arith.constant 1.000000e+00 : f32
    %96 = vector.broadcast %cst_38 : f32 to vector<2x8xf32>
    %97 = arith.subf %96, %95 : vector<2x8xf32>
    %cst_39 = arith.constant 1.000000e+00 : f32
    %98 = vector.broadcast %cst_39 : f32 to vector<2x8xf32>
    %99 = arith.divf %98, %97 : vector<2x8xf32>
    %100 = vector.shape_cast %9 : vector<2x16xf32> to vector<2x16x1xf32>
    %101 = vector.shape_cast %99 : vector<2x8xf32> to vector<2x1x8xf32>
    %102 = vector.broadcast %100 : vector<2x16x1xf32> to vector<2x16x8xf32>
    %103 = vector.broadcast %101 : vector<2x1x8xf32> to vector<2x16x8xf32>
    %104 = arith.mulf %102, %103 : vector<2x16x8xf32>
    %105 = math.exp %104 : vector<2x16x8xf32>
    %cst_40 = arith.constant dense<0.000000e+00> : vector<2x8xf32>
    %106 = vector.multi_reduction <add>, %105, %cst_40 [1] : vector<2x16x8xf32> to vector<2x8xf32>
    %107 = vector.broadcast %71 : vector<2x1xf32> to vector<2x8xf32>
    %108 = arith.cmpf ole, %106, %107 : vector<2x8xf32>
    %109 = vector.broadcast %73 : vector<2x1xf32> to vector<2x8xf32>
    %110 = arith.cmpf oge, %106, %109 : vector<2x8xf32>
    %111 = arith.andi %108, %110 : vector<2x8xi1>
    %cst_41 = arith.constant 8.000000e+00 : f32
    %112 = vector.broadcast %cst_41 : f32 to vector<2x8xf32>
    %113 = arith.select %111, %89, %112 : vector<2x8xi1>, vector<2x8xf32>
    %cst_42 = arith.constant dense<0x7F800000> : vector<2xf32>
    %114 = vector.multi_reduction <minimumf>, %113, %cst_42 [1] : vector<2x8xf32> to vector<2xf32>
    %115 = vector.shape_cast %114 : vector<2xf32> to vector<2x1xf32>
    %cst_43 = arith.constant 8.000000e+00 : f32
    %116 = vector.broadcast %cst_43 : f32 to vector<2x1xf32>
    %117 = arith.cmpf olt, %115, %116 : vector<2x1xf32>
    %118 = arith.addf %87, %115 : vector<2x1xf32>
    %cst_44 = arith.constant 7.990000e+02 : f32
    %119 = vector.broadcast %cst_44 : f32 to vector<2x1xf32>
    %120 = arith.minimumf %118, %119 : vector<2x1xf32>
    %cst_45 = arith.constant 1.250000e-03 : f32
    %121 = vector.broadcast %cst_45 : f32 to vector<2x1xf32>
    %122 = arith.mulf %121, %120 : vector<2x1xf32>
    %cst_46 = arith.constant 1.000000e+00 : f32
    %123 = vector.broadcast %cst_46 : f32 to vector<2x1xf32>
    %124 = arith.subf %123, %122 : vector<2x1xf32>
    %cst_47 = arith.constant 1.000000e+00 : f32
    %125 = vector.broadcast %cst_47 : f32 to vector<2x1xf32>
    %126 = arith.select %117, %124, %125 : vector<2x1xi1>, vector<2x1xf32>
    %cst_48 = arith.constant 1.000000e+00 : f32
    %127 = vector.broadcast %cst_48 : f32 to vector<2x1xf32>
    %128 = arith.divf %127, %126 : vector<2x1xf32>
    %129 = vector.broadcast %128 : vector<2x1xf32> to vector<2x16xf32>
    %130 = arith.mulf %5, %129 : vector<2x16xf32>
    %c0_49 = arith.constant 0 : index
    %c0_50 = arith.constant 0 : index
    %131 = vector.load %arg3[%c0_49, %c0_50] : memref<2x16xf32, #tpu.memory_space<vmem>>, vector<2x16xf32>
    tpu.vector_store %arg3[%c0_49, %c0_50], %130 {strides = array<i32>} : memref<2x16xf32, #tpu.memory_space<vmem>>, vector<2x16xf32>,
    return
  }
}

</mosaic_0001>

<bundles_post_ra>
// kernel: tpu_custom_call.1
= control target key start
LH: loop header
LB: loop body
LE: loop exit
PB: predicated region body
PF: predicated region fallthrough
CT: control target
= control target key end

     0   :  { %s1713_s0 = inlined_call_operand.vmem [shape: bf16[2,1024], index: 0, kind: input, shape index: {}]   ;;  %s1714_s1 = inlined_call_operand.vmem [shape: bf16[1024,16], index: 1, kind: input, shape index: {}]   ;;  %s1715_s2 = inlined_call_operand.vmem [shape: f32[1,16], index: 2, kind: input, shape index: {}]   ;;  %s1716_s3 = inlined_call_operand.hbm [shape: f32[2,16], index: 3, kind: output, shape index: {}]  }
   0x1   :  { %v1280_v0 = vld [vmem:[%s1714_s1 + $0x38] sm:$0xff]  ;;  %v1279_v4 = vld [vmem:[%s1714_s1 + $0x30] sm:$0xff]  ;;  %v1278_v8 = vld [vmem:[%s1714_s1 + $0x28] sm:$0xff] }
   0x2   :  { %v1288_v1 = vld [vmem:[%s1714_s1 + $0x78] sm:$0xff]  ;;  %550 = vmatpush.bf16.msra.mxu0 %v1280_v0  ;;  %v1287_v5 = vld [vmem:[%s1714_s1 + $0x70] sm:$0xff]  ;;  %v1286_v9 = vld [vmem:[%s1714_s1 + $0x68] sm:$0xff] }
   0x3   :  { %v1296_v2 = vld [vmem:[%s1714_s1 + $0xb8] sm:$0xff]  ;;  %563 = vmatpush.bf16.msra.mxu1 %v1288_v1  ;;  %v1295_v6 = vld [vmem:[%s1714_s1 + $0xb0] sm:$0xff]  ;;  %v1294_v10 = vld [vmem:[%s1714_s1 + $0xa8] sm:$0xff] }
   0x4   :  { %v1304_v3 = vld [vmem:[%s1714_s1 + $0xf8] sm:$0xff]  ;;  %576 = vmatpush.bf16.msra.mxu2 %v1296_v2  ;;  %v1303_v7 = vld [vmem:[%s1714_s1 + $0xf0] sm:$0xff]  ;;  %v1302_v11 = vld [vmem:[%s1714_s1 + $0xe8] sm:$0xff] }
   0x5   :  { %589 = vmatpush.bf16.msra.mxu3 %v1304_v3  ;;  %v1277_v12 = vld [vmem:[%s1714_s1 + $0x20] sm:$0xff]  ;;  %v1276_v17 = vld [vmem:[%s1714_s1 + $0x18] sm:$0xff]  ;;  %v1275_v21 = vld [vmem:[%s1714_s1 + $0x10] sm:$0xff] }
   0x6   :  { %551 = vmatpush.bf16.msra.mxu0 %v1279_v4  ;;  %v1285_v13 = vld [vmem:[%s1714_s1 + $0x60] sm:$0xff]  ;;  %v1284_v18 = vld [vmem:[%s1714_s1 + $0x58] sm:$0xff]  ;;  %v1283_v22 = vld [vmem:[%s1714_s1 + $0x50] sm:$0xff] }
   0x7   :  { %564 = vmatpush.bf16.msra.mxu1 %v1287_v5  ;;  %v1293_v14 = vld [vmem:[%s1714_s1 + $0xa0] sm:$0xff]  ;;  %v1292_v19 = vld [vmem:[%s1714_s1 + $0x98] sm:$0xff] }
   0x8   :  { %577 = vmatpush.bf16.msra.mxu2 %v1295_v6  ;;  %v1301_v15 = vld [vmem:[%s1714_s1 + $0xe0] sm:$0xff]  ;;  %v1300_v20 = vld [vmem:[%s1714_s1 + $0xd8] sm:$0xff] }
   0x9   :  { %590 = vmatpush.bf16.msra.mxu3 %v1303_v7  ;;  %v15_v16 = vld [vmem:[%s1713_s0] sm:$0xff] }
   0xa   :  { %552 = vmatpush.bf16.msra.mxu0 %v1278_v8  ;;  %149 = vst [vmem:[#allocation1] ss:$9 sm:$0xff] %v15_v16 }
   0xb   :  { %565 = vmatpush.bf16.msra.mxu1 %v1286_v9 }
   0xc   :  { %578 = vmatpush.bf16.msra.mxu2 %v1294_v10 }
   0xd   :  { %591 = vmatpush.bf16.msra.mxu3 %v1302_v11 }
   0xe   :  { %553 = vmatpush.bf16.msra.mxu0 %v1277_v12 }
   0xf   :  { %566 = vmatpush.bf16.msra.mxu1 %v1285_v13 }
  0x10   :  { %579 = vmatpush.bf16.msra.mxu2 %v1293_v14 }
  0x11   :  { %592 = vmatpush.bf16.msra.mxu3 %v1301_v15 }
  0x12   :  { %554 = vmatpush.bf16.msra.mxu0 %v1276_v17 }
  0x13   :  { %567 = vmatpush.bf16.msra.mxu1 %v1284_v18 }
  0x14   :  { %8 = vsyncpa [#allocation3], 0  ;;  %580 = vmatpush.bf16.msra.mxu2 %v1292_v19  ;;  %v1291_v23 = vld [vmem:[%s1714_s1 + $0x90] sm:$0xff]  ;;  %v1274_v25 = vld [vmem:[%s1714_s1 + $0x8] sm:$0xff]  ;;  %v659_v15 = vlaneseq  ;;  %vm654_vm0 = vcmask 123904   ;;  %vm718_vm5 = vcmask 818176  }
  0x15   :  { %593 = vmatpush.bf16.msra.mxu3 %v1300_v20  ;;  %v1299_v24 = vld [vmem:[%s1714_s1 + $0xd0] sm:$0xff]  ;;  %v1282_v26 = vld [vmem:[%s1714_s1 + $0x48] sm:$0xff]  ;;  %v1273_v29 = vld [vmem:[%s1714_s1] sm:$0xff]  ;;  %s1005_s7 = sshll.u32 %s1716_s3, 4  ;;  %s1006_s7 = int_to_ptr.hbm [resolvable:$true] %s1005_s7 }
  0x16   :  { %555 = vmatpush.bf16.msra.mxu0 %v1275_v21  ;;  %v1290_v27 = vld [vmem:[%s1714_s1 + $0x88] sm:$0xff]  ;;  %v1281_v30 = vld [vmem:[%s1714_s1 + $0x40] sm:$0xff]  ;;  %v1312_v33 = vld [vmem:[%s1714_s1 + $0x138] sm:$0xff]  ;;  %v682_v18 = vshrl.u32 %v659_v15, 7 }
  0x17   :  { %568 = vmatpush.bf16.msra.mxu1 %v1283_v22  ;;  %v1298_v28 = vld [vmem:[%s1714_s1 + $0xc8] sm:$0xff]  ;;  %v1289_v31 = vld [vmem:[%s1714_s1 + $0x80] sm:$0xff]  ;;  %v1320_v34 = vld [vmem:[%s1714_s1 + $0x178] sm:$0xff] }
  0x18   :  { %581 = vmatpush.bf16.msra.mxu2 %v1291_v23  ;;  %v1297_v32 = vld [vmem:[%s1714_s1 + $0xc0] sm:$0xff]  ;;  %v1328_v35 = vld [vmem:[%s1714_s1 + $0x1b8] sm:$0xff]  ;;  %v1311_v37 = vld [vmem:[%s1714_s1 + $0x130] sm:$0xff]  ;;  %1341 = vset.pattern.permute.xlu0 %v682_v18  ;;  %v689_v20 = vadd.s32 8, %v682_v18 }
  0x19   :  { %594 = vmatpush.bf16.msra.mxu3 %v1299_v24  ;;  %v1336_v36 = vld [vmem:[%s1714_s1 + $0x1f8] sm:$0xff]  ;;  %v150_v39 = vld [vmem:[#allocation1] sm:$0xff]  ;;  %v1319_v40 = vld [vmem:[%s1714_s1 + $0x170] sm:$0xff] }
  0x1a   :  { %556 = vmatpush.bf16.msra.mxu0 %v1274_v25  ;;  %v152_v38 = vld [vmem:[#allocation1 + $0x12] sm:$0xff]  ;;  %v153_v41 = vld [vmem:[#allocation1 + $0x1b] sm:$0xff]  ;;  %v151_v42 = vld [vmem:[#allocation1 + $0x9] sm:$0xff]  ;;  %1344 = vset.pattern.permute.xlu2 %v689_v20 }
  0x1b   :  { %569 = vmatpush.bf16.msra.mxu1 %v1282_v26  ;;  %v1327_v43 = vld [vmem:[%s1714_s1 + $0x1b0] sm:$0xff]  ;;  %v1310_v45 = vld [vmem:[%s1714_s1 + $0x128] sm:$0xff]  ;;  %v1309_v49 = vld [vmem:[%s1714_s1 + $0x120] sm:$0xff]  ;;  %1342 = vset.pattern.permute.xlu1 %v689_v20 }
  0x1c   :  { %582 = vmatpush.bf16.msra.mxu2 %v1290_v27  ;;  %v1335_v44 = vld [vmem:[%s1714_s1 + $0x1f0] sm:$0xff]  ;;  %v1318_v46 = vld [vmem:[%s1714_s1 + $0x168] sm:$0xff]  ;;  %v1317_v50 = vld [vmem:[%s1714_s1 + $0x160] sm:$0xff] }
  0x1d   :  { %595 = vmatpush.bf16.msra.mxu3 %v1298_v28  ;;  %v1326_v47 = vld [vmem:[%s1714_s1 + $0x1a8] sm:$0xff]  ;;  %v1325_v51 = vld [vmem:[%s1714_s1 + $0x1a0] sm:$0xff]  ;;  %v1308_v53 = vld [vmem:[%s1714_s1 + $0x118] sm:$0xff] }
  0x1e   :  { %557 = vmatpush.bf16.msra.mxu0 %v1273_v29  ;;  %v1334_v48 = vld [vmem:[%s1714_s1 + $0x1e8] sm:$0xff]  ;;  %v1333_v52 = vld [vmem:[%s1714_s1 + $0x1e0] sm:$0xff]  ;;  %v1316_v54 = vld [vmem:[%s1714_s1 + $0x158] sm:$0xff] }
  0x1f   :  { %570 = vmatpush.bf16.msra.mxu1 %v1281_v30  ;;  %v1324_v55 = vld [vmem:[%s1714_s1 + $0x198] sm:$0xff]  ;;  %v1307_v57 = vld [vmem:[%s1714_s1 + $0x110] sm:$0xff]  ;;  %v1306_v61 = vld [vmem:[%s1714_s1 + $0x108] sm:$0xff] }
  0x20   :  { %583 = vmatpush.bf16.msra.mxu2 %v1289_v31  ;;  %v1332_v56 = vld [vmem:[%s1714_s1 + $0x1d8] sm:$0xff]  ;;  %v1315_v58 = vld [vmem:[%s1714_s1 + $0x150] sm:$0xff]  ;;  %v1314_v62 = vld [vmem:[%s1714_s1 + $0x148] sm:$0xff] }
  0x21   :  { %596 = vmatpush.bf16.msra.mxu3 %v1297_v32  ;;  %558 = vmatmul.bf16.vlgmr.msra.gmra.mxu0 %v150_v39  ;;  %v1323_v59 = vld [vmem:[%s1714_s1 + $0x190] sm:$0xff]  ;;  %v1322_v63 = vld [vmem:[%s1714_s1 + $0x188] sm:$0xff]  ;;  %v1305_v1 = vld [vmem:[%s1714_s1 + $0x100] sm:$0xff] }
  0x22   :  { %602 = vmatpush.bf16.msrb.mxu0 %v1312_v33  ;;  %571 = vmatmul.bf16.vlgmr.msra.gmra.mxu1 %v151_v42  ;;  %v1331_v60 = vld [vmem:[%s1714_s1 + $0x1d0] sm:$0xff]  ;;  %v1330_v0 = vld [vmem:[%s1714_s1 + $0x1c8] sm:$0xff]  ;;  %v1313_v2 = vld [vmem:[%s1714_s1 + $0x140] sm:$0xff]  ;;  %v660_v42 = vand.u32 127, %v659_v15 }
  0x23   :  { %615 = vmatpush.bf16.msrb.mxu1 %v1320_v34  ;;  %584 = vmatmul.bf16.vlgmr.msra.gmra.mxu2 %v152_v38  ;;  %v1321_v3 = vld [vmem:[%s1714_s1 + $0x180] sm:$0xff]  ;;  %v155_v6 = vld [vmem:[#allocation1 + $0x2d] sm:$0xff]  ;;  %v156_v7 = vld [vmem:[#allocation1 + $0x36] sm:$0xff] }
  0x24   :  { %628 = vmatpush.bf16.msrb.mxu2 %v1328_v35  ;;  %597 = vmatmul.bf16.vlgmr.msra.gmra.mxu3 %v153_v41  ;;  %v1329_v4 = vld [vmem:[%s1714_s1 + $0x1c0] sm:$0xff] }
  0x25   :  { %641 = vmatpush.bf16.msrb.mxu3 %v1336_v36  ;;  %v154_v5 = vld [vmem:[#allocation1 + $0x24] sm:$0xff]  ;;  %v1348_v16 = vld [vmem:[%s1715_s2] ss:$0 sm:$0xff]  ;;  %s1412_s2 = smov [#allocation2]  }
  0x26   :  { %603 = vmatpush.bf16.msrb.mxu0 %v1311_v37  ;;  %v157_v8 = vld [vmem:[#allocation1 + $0x3f] sm:$0xff]  ;;  %s1003_s4 = sshll.u32 %s1412_s2, 4  ;;  %s1004_s4 = int_to_ptr.vmem [resolvable:$true] %s1003_s4 }
  0x27   :  { %616 = vmatpush.bf16.msrb.mxu1 %v1319_v40 }
  0x28   :  { %629 = vmatpush.bf16.msrb.mxu2 %v1327_v43  ;;  %v1636_v43 = vcvt.s32.f32 %v660_v42 }
  0x29   :  { %642 = vmatpush.bf16.msrb.mxu3 %v1335_v44 }
  0x2a   :  { %604 = vmatpush.bf16.msrb.mxu0 %v1310_v45  ;;  %v662_v44 = vmul.f32 8.0, %v1636_v43 }
  0x2b   :  { %617 = vmatpush.bf16.msrb.mxu1 %v1318_v46 }
  0x2c   :  { %630 = vmatpush.bf16.msrb.mxu2 %v1326_v47  ;;  %v663_v45 = vmul.f32 0.00125, %v662_v44  ;;  %v1410_v44 = vmov 0.6666667  }
  0x2d   :  { %643 = vmatpush.bf16.msrb.mxu3 %v1334_v48 }
  0x2e   :  { %605 = vmatpush.bf16.msrb.mxu0 %v1309_v49  ;;  %v664_v46 = vsub.f32 1.0, %v663_v45 }
  0x2f   :  { %618 = vmatpush.bf16.msrb.mxu1 %v1317_v50 }
  0x30   :  { %631 = vmatpush.bf16.msrb.mxu2 %v1325_v51  ;;  %1349 = vrcp.f32 %v664_v46  ;;  %vm670_vm1 = vweird.f32 %v664_v46  ;;  %v676_v51 = vand.u32 2147483648, %v664_v46 }
  0x31   :  { %644 = vmatpush.bf16.msrb.mxu3 %v1333_v52 }
  0x32   :  { %606 = vmatpush.bf16.msrb.mxu0 %v1308_v53  ;;  %v674_v53 = vand.u32 2147483647, %v664_v46 }
  0x33   :  { %619 = vmatpush.bf16.msrb.mxu1 %v1316_v54  ;;  %v677_v54 = vor.u32 1.1754944e-38, %v676_v51 }
  0x34   :  { %632 = vmatpush.bf16.msrb.mxu2 %v1324_v55  ;;  %vm675_vm4 = vcmp.eq.f32.partialorder %v674_v53, 8.507059e+37 }
  0x35   :  { %645 = vmatpush.bf16.msrb.mxu3 %v1332_v56 }
  0x36   :  { %607 = vmatpush.bf16.msrb.mxu0 %v1307_v57  ;;  %v1350_v47 = vpop.eup %1349 }
  0x37   :  { %620 = vmatpush.bf16.msrb.mxu1 %v1315_v58  ;;  %v666_v48 = vmul.f32 %v1350_v47, %v664_v46  ;;  %vm671_vm2 = vweird.f32 %v1350_v47 }
  0x38   :  { %633 = vmatpush.bf16.msrb.mxu2 %v1323_v59  ;;  %vm672_vm3 = vmor %vm670_vm1, %vm671_vm2 }
  0x39   :  { %646 = vmatpush.bf16.msrb.mxu3 %v1331_v60  ;;  %v667_v49 = vsub.f32 1.0, %v666_v48  ;;  %v1411_v48 = vmov 0.93333334  }
  0x3a   :  { %608 = vmatpush.bf16.msrb.mxu0 %v1306_v61 }
  0x3b   :  { %621 = vmatpush.bf16.msrb.mxu1 %v1314_v62  ;;  %v668_v50 = vmul.f32 %v1350_v47, %v667_v49 }
  0x3c   :  { %634 = vmatpush.bf16.msrb.mxu2 %v1322_v63 }
  0x3d   :  { %647 = vmatpush.bf16.msrb.mxu3 %v1330_v0  ;;  %v669_v52 = vadd.f32 %v1350_v47, %v668_v50 }
  0x3e   :  { %609 = vmatpush.bf16.msrb.mxu0 %v1305_v1 }
  0x3f   :  { %622 = vmatpush.bf16.msrb.mxu1 %v1313_v2  ;;  %v673_v55 = vsel %vm672_vm3, %v1350_v47, %v669_v52 }
  0x40   :  { %635 = vmatpush.bf16.msrb.mxu2 %v1321_v3  ;;  %v678_v56 = vsel %vm675_vm4, %v677_v54, %v673_v55 }
  0x41   :  { %648 = vmatpush.bf16.msrb.mxu3 %v1329_v4  ;;  %610 = vmatmul.bf16.vlgmr.msrb.gmra.mxu0 %v154_v5  ;;  %v1409_v4 = vmov 0  }
  0x42   :  { %623 = vmatmul.bf16.vlgmr.msrb.gmra.mxu1 %v155_v6 }
  0x43   :  { %636 = vmatmul.bf16.vlgmr.msrb.gmra.mxu2 %v156_v7 }
  0x44   :  { %649 = vmatmul.bf16.vlgmr.msrb.gmra.mxu3 %v157_v8 }
  0x9e   :  { %v559_v9 = vpop.f32.mrf.mxu0 }
  0x9f   :  { %v572_v10 = vpop.f32.mrf.mxu1  ;;  %v560_v21 = vadd.f32 %v1348_v16, %v559_v9 }
  0xa1   :  { %v573_v22 = vadd.f32 %v572_v10, %v560_v21 }
  0xa6   :  { %v585_v11 = vpop.f32.mrf.mxu2  ;;  %v561_v13 = vpop.f32.mrf.mxu0 }
  0xa7   :  { %v598_v12 = vpop.f32.mrf.mxu3  ;;  %v574_v14 = vpop.f32.mrf.mxu1  ;;  %v586_v23 = vadd.f32 %v585_v11, %v573_v22 }
  0xa9   :  { %v599_v24 = vadd.f32 %v598_v12, %v586_v23 }
  0xae   :  { %v587_v17 = vpop.f32.mrf.mxu2 }
  0xaf   :  { %v600_v19 = vpop.f32.mrf.mxu3 }
  0xbe   :  { %v611_v25 = vpop.f32.mrf.mxu0 }
  0xbf   :  { %v624_v26 = vpop.f32.mrf.mxu1  ;;  %v612_v27 = vadd.f32 %v611_v25, %v599_v24 }
  0xc1   :  { %v625_v28 = vadd.f32 %v624_v26, %v612_v27 }
  0xc6   :  { %v637_v29 = vpop.f32.mrf.mxu2  ;;  %v613_v32 = vpop.f32.mrf.mxu0 }
  0xc7   :  { %v650_v30 = vpop.f32.mrf.mxu3  ;;  %v638_v31 = vadd.f32 %v637_v29, %v625_v28  ;;  %v626_v33 = vpop.f32.mrf.mxu1 }
  0xc9   :  { %v1631_v34 = vadd.f32 %v650_v30, %v638_v31 }
  0xcb   :  { %v655_v35 = vsel %vm654_vm0, %v1631_v34, -inf }
  0xcc   :  { %656 = vmax.xlane.f32.xlu0 %v655_v35 }
  0xce   :  { %v639_v36 = vpop.f32.mrf.mxu2 }
  0xcf   :  { %v652_v37 = vpop.f32.mrf.mxu3 }
 0x13f   :  { %v657_v38 = vpop.xlane.xlu0 %656 }
 0x140   :  { %v658_v39 = vsub.f32 %v1631_v34, %v657_v38 }
 0x142   :  { %v693_v40 = vperm.slane %v658_v39, 1  ;;  %v680_v41 = vperm.slane %v658_v39, 0 }
 0x144   :  { %704 = vperm.xlu1 %1342, %v693_v40   ;;  %698 = vperm.xlu0 %1341, %v693_v40  }
 0x145   :  { %691 = vperm.xlu2 %1344, %v680_v41  }
 0x14c   :  { %1343 = vset.pattern.permute.xlu1 %v682_v18  ;;  %1347 = vset.pattern.permute.xlu0 %v1409_v4 }
 0x14d   :  { %1345 = vset.pattern.permute.xlu2 %v1409_v4 }
 0x154   :  { %685 = vperm.xlu1 %1343, %v680_v41  }
 0x15c   :  { %1346 = vset.pattern.permute.xlu1 %v1409_v4 }
 0x19f   :  { %v1645_v63 = vpop.permute.xlu2 %691 }
 0x1a0   :  { %v707_v1 = vmul.f32 %v1645_v63, %v678_v56 }
 0x1a2   :  { %v712_v7 = vmul.f32 1.442695, %v707_v1 }
 0x1b6   :  { %v1639_v57 = vpop.permute.xlu1 %704  ;;  %v1641_v58 = vpop.permute.xlu0 %698 }
 0x1b7   :  { %v709_v59 = vmul.f32 %v1639_v57, %v678_v56  ;;  %v708_v60 = vmul.f32 %v1641_v58, %v678_v56 }
 0x1b9   :  { %v716_v61 = vmul.f32 1.442695, %v709_v59  ;;  %v714_v62 = vmul.f32 1.442695, %v708_v60 }
 0x1bb   :  { %1351 = vpow2.f32 %v716_v61 }
 0x1bc   :  { %1353 = vpow2.f32 %v714_v62 }
 0x1bd   :  { %1355 = vpow2.f32 %v712_v7 }
 0x1c1   :  { %v1352_v0 = vpop.eup %1351 }
 0x1c2   :  { %v1354_v2 = vpop.eup %1353  ;;  %v729_v3 = vsel %vm718_vm5, %v1352_v0, 0.0 }
 0x1c3   :  { %v728_v5 = vsel %vm718_vm5, %v1354_v2, 0.0  ;;  %v1356_v16 = vpop.eup %1355 }
 0x1c4   :  { %v730_v6 = vadd.f32 %v729_v3, %v728_v5  ;;  %v720_v19 = vsel %vm718_vm5, %v1356_v16, 0.0 }
 0x1c6   :  { %v731_v8 = vrot.slane %v730_v6, 4  ;;  %v1653_v9 = vpop.permute.xlu1 %685 }
 0x1c7   :  { %v706_v10 = vmul.f32 %v1653_v9, %v678_v56 }
 0x1c8   :  { %v732_v11 = vadd.f32 %v731_v8, %v730_v6 }
 0x1c9   :  { %v710_v12 = vmul.f32 1.442695, %v706_v10 }
 0x1ca   :  { %v733_v13 = vrot.slane %v732_v11, 2 }
 0x1cb   :  { %1357 = vpow2.f32 %v710_v12 }
 0x1cc   :  { %v734_v14 = vadd.f32 %v733_v13, %v732_v11 }
 0x1ce   :  { %v735_v15 = vrot.slane %v734_v14, 1 }
 0x1d0   :  { %v1656_v17 = vadd.f32 %v735_v15, %v734_v14 }
 0x1d1   :  { %v1358_v18 = vpop.eup %1357 }
 0x1d2   :  { %1359 = vrcp.f32 %v1656_v17  ;;  %v719_v20 = vsel %vm718_vm5, %v1358_v18, 0.0  ;;  %v763_v29 = vand.u32 2147483648, %v1656_v17  ;;  %v761_v32 = vand.u32 2147483647, %v1656_v17 }
 0x1d3   :  { %v721_v21 = vadd.f32 %v720_v19, %v719_v20  ;;  %vm757_vm7 = vweird.f32 %v1656_v17 }
 0x1d4   :  { %v764_v36 = vor.u32 1.1754944e-38, %v763_v29  ;;  %vm762_vm9 = vcmp.eq.f32.partialorder %v761_v32, 8.507059e+37 }
 0x1d5   :  { %v722_v22 = vrot.slane %v721_v21, 4 }
 0x1d7   :  { %v723_v23 = vadd.f32 %v722_v22, %v721_v21 }
 0x1d8   :  { %v1360_v24 = vpop.eup %1359 }
 0x1d9   :  { %v724_v25 = vrot.slane %v723_v23, 2  ;;  %v753_v26 = vmul.f32 %v1360_v24, %v1656_v17  ;;  %vm758_vm6 = vweird.f32 %v1360_v24 }
 0x1da   :  { %vm759_vm8 = vmor %vm757_vm7, %vm758_vm6 }
 0x1db   :  { %v725_v27 = vadd.f32 %v724_v25, %v723_v23  ;;  %v754_v28 = vsub.f32 1.0, %v753_v26 }
 0x1dd   :  { %v726_v30 = vrot.slane %v725_v27, 1  ;;  %v755_v31 = vmul.f32 %v1360_v24, %v754_v28 }
 0x1df   :  { %v1664_v33 = vadd.f32 %v726_v30, %v725_v27  ;;  %v756_v35 = vadd.f32 %v1360_v24, %v755_v31 }
 0x1e1   :  { %1361 = vrcp.f32 %v1664_v33  ;;  %v760_v37 = vsel %vm759_vm8, %v1360_v24, %v756_v35  ;;  %v748_v52 = vand.u32 2147483648, %v1664_v33  ;;  %v746_v55 = vand.u32 2147483647, %v1664_v33 }
 0x1e2   :  { %v765_v38 = vsel %vm762_vm9, %v764_v36, %v760_v37  ;;  %vm742_vm15 = vweird.f32 %v1664_v33 }
 0x1e3   :  { %vm768_vm10 = vcmp.ge.f32.partialorder %v765_v38, 0.33333334  ;;  %vm772_vm11 = vcmp.ge.f32.partialorder %v765_v38, 0.6666667  ;;  %v749_v61 = vor.u32 1.1754944e-38, %v748_v52  ;;  %vm747_vm2 = vcmp.eq.f32.partialorder %v746_v55, 8.507059e+37 }
 0x1e4   :  { %v770_v39 = vsel %vm768_vm10, 1, %v1409_v4  ;;  %v774_v40 = vsel %vm772_vm11, 1, %v1409_v4 }
 0x1e5   :  { %v776_v41 = vadd.s32 %v774_v40, %v770_v39 }
 0x1e7   :  { %v1362_v42 = vpop.eup %1361  ;;  %vm778_vm12 = vcmp.eq.s32.totalorder %v776_v41, 0  ;;  %vm780_vm13 = vcmp.eq.s32.totalorder %v776_v41, 1 }
 0x1e8   :  { %v786_v45 = vsel %vm780_vm13, 0.33333334, %v1410_v44  ;;  %v738_v46 = vmul.f32 %v1362_v42, %v1664_v33  ;;  %v782_v49 = vsel %vm780_vm13, 0.8666667, %v1411_v48  ;;  %vm743_vm14 = vweird.f32 %v1362_v42 }
 0x1e9   :  { %v788_v47 = vsel %vm778_vm12, 0.0, %v786_v45  ;;  %v784_v56 = vsel %vm778_vm12, 0.8, %v782_v49  ;;  %vm744_vm1 = vmor %vm742_vm15, %vm743_vm14 }
 0x1ea   :  { %v790_v50 = vsub.f32 %v765_v38, %v788_v47  ;;  %v739_v51 = vsub.f32 1.0, %v738_v46 }
 0x1ec   :  { %v792_v53 = vmul.f32 0.25, %v790_v50  ;;  %v740_v54 = vmul.f32 %v1362_v42, %v739_v51 }
 0x1ee   :  { %v794_v59 = vadd.f32 %v792_v53, %v784_v56  ;;  %v741_v60 = vadd.f32 %v1362_v42, %v740_v54 }
 0x1f0   :  { %v1271_v62 = vadd.f32 -0.01, %v794_v59  ;;  %v745_v0 = vsel %vm744_vm1, %v1362_v42, %v741_v60  ;;  %v798_v15 = vadd.f32 0.01, %v794_v59 }
 0x1f1   :  { %v750_v1 = vsel %vm747_vm2, %v749_v61, %v745_v0 }
 0x1f2   :  { %vm800_vm3 = vcmp.gt.f32.partialorder %v1271_v62, 0.0  ;;  %vm767_vm4 = vcmp.ge.f32.partialorder %v750_v1, 0.33333334  ;;  %vm771_vm5 = vcmp.ge.f32.partialorder %v750_v1, 0.6666667  ;;  %v861_v52 = vand.u32 2147483648, %v798_v15 }
 0x1f3   :  { %v802_v2 = vsel %vm800_vm3, %v1271_v62, 1.0  ;;  %v769_v3 = vsel %vm767_vm4, 1, %v1409_v4  ;;  %v773_v5 = vsel %vm771_vm5, 1, %v1409_v4  ;;  %v859_v53 = vand.u32 2147483647, %v798_v15 }
 0x1f4   :  { %1363 = vrcp.f32 %v802_v2  ;;  %v775_v6 = vadd.s32 %v773_v5, %v769_v3  ;;  %v829_v19 = vand.u32 2147483648, %v802_v2  ;;  %v827_v22 = vand.u32 2147483647, %v802_v2 }
 0x1f5   :  { %vm823_vm9 = vweird.f32 %v802_v2  ;;  %1365 = vrcp.f32 %v798_v15  ;;  %v862_v56 = vor.u32 1.1754944e-38, %v861_v52  ;;  %vm860_vm5 = vcmp.eq.f32.partialorder %v859_v53, 8.507059e+37 }
 0x1f6   :  { %vm777_vm6 = vcmp.eq.s32.totalorder %v775_v6, 0  ;;  %vm779_vm7 = vcmp.eq.s32.totalorder %v775_v6, 1  ;;  %v830_v24 = vor.u32 1.1754944e-38, %v829_v19  ;;  %vm828_vm12 = vcmp.eq.f32.partialorder %v827_v22, 8.507059e+37 }
 0x1f7   :  { %v785_v7 = vsel %vm779_vm7, 0.33333334, %v1410_v44  ;;  %v781_v11 = vsel %vm779_vm7, 0.8666667, %v1411_v48 }
 0x1f8   :  { %v787_v8 = vsel %vm777_vm6, 0.0, %v785_v7  ;;  %v783_v18 = vsel %vm777_vm6, 0.8, %v781_v11 }
 0x1f9   :  { %v789_v12 = vsub.f32 %v750_v1, %v787_v8 }
 0x1fa   :  { %v1364_v10 = vpop.eup %1363 }
 0x1fb   :  { %v819_v13 = vmul.f32 %v1364_v10, %v802_v2  ;;  %v791_v14 = vmul.f32 0.25, %v789_v12  ;;  %vm824_vm8 = vweird.f32 %v1364_v10  ;;  %v1366_v30 = vpop.eup %1365 }
 0x1fc   :  { %vm825_vm10 = vmor %vm823_vm9, %vm824_vm8  ;;  %v851_v32 = vmul.f32 %v1366_v30, %v798_v15  ;;  %vm856_vm2 = vweird.f32 %v1366_v30 }
 0x1fd   :  { %v820_v16 = vsub.f32 1.0, %v819_v13  ;;  %v793_v20 = vadd.f32 %v791_v14, %v783_v18 }
 0x1fe   :  { %v852_v38 = vsub.f32 1.0, %v851_v32 }
 0x1ff   :  { %v821_v21 = vmul.f32 %v1364_v10, %v820_v16  ;;  %v1270_v4 = vadd.f32 -0.01, %v793_v20  ;;  %v797_v29 = vadd.f32 0.01, %v793_v20 }
 0x200   :  { %v853_v45 = vmul.f32 %v1366_v30, %v852_v38 }
 0x201   :  { %v822_v23 = vadd.f32 %v1364_v10, %v821_v21  ;;  %vm799_vm11 = vcmp.gt.f32.partialorder %v1270_v4, 0.0  ;;  %v846_v61 = vand.u32 2147483648, %v797_v29  ;;  %vm840_vm7 = vweird.f32 %v797_v29 }
 0x202   :  { %v801_v26 = vsel %vm799_vm11, %v1270_v4, 1.0  ;;  %v854_v50 = vadd.f32 %v1366_v30, %v853_v45  ;;  %v844_v62 = vand.u32 2147483647, %v797_v29 }
 0x203   :  { %v826_v25 = vsel %vm825_vm10, %v1364_v10, %v822_v23  ;;  %1367 = vrcp.f32 %v801_v26  ;;  %v814_v37 = vand.u32 2147483648, %v801_v26  ;;  %v812_v41 = vand.u32 2147483647, %v801_v26 }
 0x204   :  { %v831_v27 = vsel %vm828_vm12, %v830_v24, %v826_v25  ;;  %1369 = vrcp.f32 %v797_v29  ;;  %vm808_vm14 = vweird.f32 %v801_v26  ;;  %v847_v1 = vor.u32 1.1754944e-38, %v846_v61 }
 0x205   :  { %v834_v28 = vsel %vm800_vm3, %v831_v27, inf  ;;  %v815_v44 = vor.u32 1.1754944e-38, %v814_v37  ;;  %vm813_vm1 = vcmp.eq.f32.partialorder %v812_v41, 8.507059e+37  ;;  %vm855_vm3 = vweird.f32 %v798_v15 }
 0x206   :  { %872 = vperm.xlu2 %1345, %v834_v28   ;;  %vm857_vm4 = vmor %vm855_vm3, %vm856_vm2  ;;  %vm845_vm9 = vcmp.eq.f32.partialorder %v844_v62, 8.507059e+37  ;;  %vm929_vm3 = vcmask 64512  }
 0x207   :  { %v858_v54 = vsel %vm857_vm4, %v1366_v30, %v854_v50 }
 0x208   :  { %v863_v59 = vsel %vm860_vm5, %v862_v56, %v858_v54 }
 0x209   :  { %v1368_v31 = vpop.eup %1367 }
 0x20a   :  { %v804_v35 = vmul.f32 %v1368_v31, %v801_v26  ;;  %v1370_v39 = vpop.eup %1369  ;;  %vm809_vm13 = vweird.f32 %v1368_v31 }
 0x20b   :  { %vm810_vm15 = vmor %vm808_vm14, %vm809_vm13  ;;  %v836_v46 = vmul.f32 %v1370_v39, %v797_v29  ;;  %vm841_vm6 = vweird.f32 %v1370_v39  ;;  %vm885_vm13 = vcmask 812032  }
 0x20c   :  { %v805_v36 = vsub.f32 1.0, %v804_v35  ;;  %vm842_vm8 = vmor %vm840_vm7, %vm841_vm6 }
 0x20d   :  { %v837_v51 = vsub.f32 1.0, %v836_v46 }
 0x20e   :  { %v806_v40 = vmul.f32 %v1368_v31, %v805_v36 }
 0x20f   :  { %v838_v55 = vmul.f32 %v1370_v39, %v837_v51 }
 0x210   :  { %v807_v42 = vadd.f32 %v1368_v31, %v806_v40 }
 0x211   :  { %v839_v60 = vadd.f32 %v1370_v39, %v838_v55 }
 0x212   :  { %v811_v47 = vsel %vm810_vm15, %v1368_v31, %v807_v42 }
 0x213   :  { %v816_v48 = vsel %vm813_vm1, %v815_v44, %v811_v47  ;;  %v843_v0 = vsel %vm842_vm8, %v1370_v39, %v839_v60 }
 0x214   :  { %v833_v49 = vsel %vm799_vm11, %v816_v48, inf  ;;  %v848_v2 = vsel %vm845_vm9, %v847_v1, %v843_v0  ;;  %vm882_vm11 = vcmask 1041409  }
 0x215   :  { %867 = vperm.xlu1 %1346, %v833_v49  }
 0x21d   :  { %957 = vperm.xlu1 %1346, %v863_v59  }
 0x225   :  { %952 = vperm.xlu1 %1346, %v848_v2  }
 0x260   :  { %v1680_v3 = vpop.permute.xlu2 %872 }
 0x261   :  { %vm876_vm10 = vcmp.le.f32.partialorder %v1656_v17, %v1680_v3 }
 0x262   :  { %v878_v5 = vsel %vm876_vm10, %v1636_v43, 100.0  ;;  %vm971_vm10 = vcmask 58368  }
 0x263   :  { %v881_v7 = vrot.slane %v878_v5, 7 }
 0x287   :  { %v1685_v6 = vpop.permute.xlu1 %867 }
 0x288   :  { %vm875_vm12 = vcmp.le.f32.partialorder %v1664_v33, %v1685_v6 }
 0x289   :  { %v877_v8 = vsel %vm875_vm12, %v1636_v43, 100.0 }
 0x28a   :  { %v883_v10 = vsel %vm882_vm11, %v881_v7, %v877_v8 }
 0x28b   :  { %v886_v11 = vsel %vm885_vm13, %v883_v10, inf }
 0x28c   :  { %887 = vmin.xlane.f32.xlu2 %v886_v11 }
 0x28f   :  { %v958_v49 = vpop.permute.xlu1 %957 }
 0x297   :  { %v953_v62 = vpop.permute.xlu1 %952 }
 0x2ff   :  { %v888_v12 = vpop.xlane.xlu2 %887 }
 0x300   :  { %v889_v13 = vmul.f32 8.0, %v888_v12 }
 0x302   :  { %v1691_v14 = vadd.f32 -7.0, %v889_v13 }
 0x304   :  { %v891_v17 = vmax.f32 %v1691_v14, 0.0 }
 0x306   :  { %v892_v15 = vadd.f32 %v891_v17, %v1636_v43 }
 0x308   :  { %v893_v16 = vmin.f32 %v892_v15, 799.0 }
 0x30a   :  { %v894_v18 = vmul.f32 0.00125, %v893_v16 }
 0x30c   :  { %v895_v33 = vsub.f32 1.0, %v894_v18 }
 0x30e   :  { %1371 = vrcp.f32 %v895_v33  ;;  %v907_v22 = vand.u32 2147483648, %v895_v33  ;;  %v905_v23 = vand.u32 2147483647, %v895_v33  ;;  %vm901_vm15 = vweird.f32 %v895_v33 }
 0x310   :  { %v908_v25 = vor.u32 1.1754944e-38, %v907_v22  ;;  %vm906_vm2 = vcmp.eq.f32.partialorder %v905_v23, 8.507059e+37 }
 0x314   :  { %v1372_v19 = vpop.eup %1371 }
 0x315   :  { %v897_v20 = vmul.f32 %v1372_v19, %v895_v33  ;;  %vm902_vm14 = vweird.f32 %v1372_v19 }
 0x316   :  { %vm903_vm1 = vmor %vm901_vm15, %vm902_vm14 }
 0x317   :  { %v898_v21 = vsub.f32 1.0, %v897_v20 }
 0x319   :  { %v899_v4 = vmul.f32 %v1372_v19, %v898_v21 }
 0x31b   :  { %v900_v24 = vadd.f32 %v1372_v19, %v899_v4 }
 0x31d   :  { %v904_v26 = vsel %vm903_vm1, %v1372_v19, %v900_v24 }
 0x31e   :  { %v909_v27 = vsel %vm906_vm2, %v908_v25, %v904_v26 }
 0x31f   :  { %v912_v28 = vrot.slane %v909_v27, 1  ;;  %v913_v29 = vperm.slane %v909_v27, 0 }
 0x321   :  { %v914_v30 = vperm.slane %v912_v28, 0  ;;  %v917_v31 = vmul.f32 %v913_v29, %v1653_v9  ;;  %v918_v32 = vmul.f32 %v913_v29, %v1645_v63 }
 0x323   :  { %v919_v35 = vmul.f32 %v914_v30, %v1641_v58  ;;  %v920_v36 = vmul.f32 %v914_v30, %v1639_v57  ;;  %v921_v37 = vmul.f32 1.442695, %v917_v31  ;;  %v923_v38 = vmul.f32 1.442695, %v918_v32 }
 0x325   :  { %v925_v39 = vmul.f32 1.442695, %v919_v35  ;;  %v927_v40 = vmul.f32 1.442695, %v920_v36  ;;  %1373 = vpow2.f32 %v921_v37 }
 0x326   :  { %1375 = vpow2.f32 %v923_v38 }
 0x327   :  { %1377 = vpow2.f32 %v925_v39 }
 0x328   :  { %1379 = vpow2.f32 %v927_v40 }
 0x32b   :  { %v1374_v41 = vpop.eup %1373 }
 0x32c   :  { %v1376_v42 = vpop.eup %1375  ;;  %v930_v44 = vsel %vm929_vm3, %v1374_v41, 0.0 }
 0x32d   :  { %v1378_v45 = vpop.eup %1377  ;;  %v931_v9 = vsel %vm929_vm3, %v1376_v42, 0.0 }
 0x32e   :  { %v1380_v46 = vpop.eup %1379  ;;  %v932_v63 = vadd.f32 %v931_v9, %v930_v44  ;;  %v939_v47 = vsel %vm929_vm3, %v1378_v45, 0.0 }
 0x32f   :  { %v940_v58 = vsel %vm929_vm3, %v1380_v46, 0.0 }
 0x330   :  { %v933_v48 = vrot.slane %v932_v63, 4  ;;  %v941_v57 = vadd.f32 %v940_v58, %v939_v47 }
 0x332   :  { %v934_v50 = vadd.f32 %v933_v48, %v932_v63  ;;  %v942_v51 = vrot.slane %v941_v57, 4 }
 0x334   :  { %v935_v52 = vrot.slane %v934_v50, 2  ;;  %v943_v53 = vadd.f32 %v942_v51, %v941_v57 }
 0x336   :  { %v936_v54 = vadd.f32 %v935_v52, %v934_v50  ;;  %v944_v55 = vrot.slane %v943_v53, 2 }
 0x338   :  { %v937_v56 = vrot.slane %v936_v54, 1  ;;  %v945_v59 = vadd.f32 %v944_v55, %v943_v53 }
 0x33a   :  { %v938_v60 = vadd.f32 %v937_v56, %v936_v54  ;;  %v946_v61 = vrot.slane %v945_v59, 1 }
 0x33c   :  { %v947_v0 = vadd.f32 %v946_v61, %v945_v59  ;;  %vm948_vm4 = vcmp.le.f32.partialorder %v938_v60, %v1685_v6  ;;  %vm960_vm5 = vcmp.ge.f32.partialorder %v938_v60, %v953_v62 }
 0x33d   :  { %vm962_vm8 = vmand %vm948_vm4, %vm960_vm5 }
 0x33e   :  { %vm949_vm6 = vcmp.le.f32.partialorder %v947_v0, %v1680_v3  ;;  %vm961_vm7 = vcmp.ge.f32.partialorder %v947_v0, %v958_v49  ;;  %v964_v5 = vsel %vm962_vm8, %v1636_v43, 8.0 }
 0x33f   :  { %vm963_vm9 = vmand %vm949_vm6, %vm961_vm7 }
 0x340   :  { %v965_v1 = vsel %vm963_vm9, %v1636_v43, 8.0 }
 0x341   :  { %v968_v2 = vrot.slane %v965_v1, 7 }
 0x343   :  { %v969_v7 = vsel %vm882_vm11, %v968_v2, %v964_v5 }
 0x344   :  { %v972_v8 = vsel %vm971_vm10, %v969_v7, inf }
 0x345   :  { %973 = vmin.xlane.f32.xlu1 %v972_v8 }
 0x3b8   :  { %v974_v10 = vpop.xlane.xlu1 %973 }
 0x3b9   :  { %v976_v6 = vadd.f32 %v974_v10, %v891_v17  ;;  %vm975_vm12 = vcmp.lt.f32.partialorder %v974_v10, 8.0 }
 0x3bb   :  { %v977_v11 = vmin.f32 %v976_v6, 799.0 }
 0x3bd   :  { %v978_v12 = vmul.f32 0.00125, %v977_v11 }
 0x3bf   :  { %v979_v3 = vsub.f32 1.0, %v978_v12 }
 0x3c1   :  { %v980_v13 = vsel %vm975_vm12, %v979_v3, 1.0 }
 0x3c2   :  { %1381 = vrcp.f32 %v980_v13  ;;  %v992_v33 = vand.u32 2147483648, %v980_v13  ;;  %v990_v43 = vand.u32 2147483647, %v980_v13  ;;  %vm986_vm11 = vweird.f32 %v980_v13 }
 0x3c4   :  { %v993_v21 = vor.u32 1.1754944e-38, %v992_v33  ;;  %vm991_vm15 = vcmp.eq.f32.partialorder %v990_v43, 8.507059e+37 }
 0x3c8   :  { %v1382_v15 = vpop.eup %1381 }
 0x3c9   :  { %v982_v16 = vmul.f32 %v1382_v15, %v980_v13  ;;  %vm987_vm13 = vweird.f32 %v1382_v15 }
 0x3ca   :  { %vm988_vm14 = vmor %vm986_vm11, %vm987_vm13 }
 0x3cb   :  { %v983_v18 = vsub.f32 1.0, %v982_v16 }
 0x3cd   :  { %v984_v19 = vmul.f32 %v1382_v15, %v983_v18 }
 0x3cf   :  { %v985_v20 = vadd.f32 %v1382_v15, %v984_v19 }
 0x3d1   :  { %v989_v14 = vsel %vm988_vm14, %v1382_v15, %v985_v20 }
 0x3d2   :  { %v994_v17 = vsel %vm991_vm15, %v993_v21, %v989_v14 }
 0x3d3   :  { %v996_v22 = vmul.f32 %v994_v17, %v1631_v34 }
 0x3d5   :  { %997 = vst.msk [vmem:[#allocation2] sm:$0x3] %vm654_vm0, %v996_v22 }
 0x3d6   :  { %1008 = dma.vmem_to_hbm [thread:$0]  %s1004_s4, 32, %s1006_s7, [#allocation3]  }
 0x3d7   :  { %1407 = dma.done.wait [#allocation3], 32  }
 0x3d8   :  { %1408 = vsyncadd [#allocation3], 4294967264 }
 0x3d9   :  { %1013 = vsyncpa [#allocation3], 1 }

</bundles_post_ra>
